<compile_context>
chip_gen: v6e
topology: v6e:2x2x1
jax: 0.10.0
libtpu: 0.0.40
codegen_flags: <defaults>
</compile_context>

<pallas_src>
import functools

import jax
import jax.numpy as jnp
from jax import lax
from jax.experimental import pallas as pl
from jax.experimental.pallas import tpu as pltpu

EPS = 1e-5  # PyTorch InstanceNorm2d default


def _round_up(x, m):
    return (x + m - 1) // m * m


def _vmem_budget():
    """(working-set budget, scoped-vmem limit) in bytes, per TPU generation."""
    cap = 64 * 1024 * 1024
    try:
        cap = getattr(pltpu.get_tpu_info(), "vmem_capacity_bytes", cap)
    except Exception:  # pragma: no cover - conservative fallback off-TPU / old jax
        pass
    if cap >= 128 * 1024 * 1024:        # v5e / v6e class
        return 56 * 1024 * 1024, 80 * 1024 * 1024
    return 24 * 1024 * 1024, 40 * 1024 * 1024   # v7x class (64 MiB VMEM)


def _valid_col_mask(pos_f32, w_pad, width):
    # col = pos mod w_pad via exact f32 divide/floor (exact for pos < ~2^23, i.e. any
    # realistic image); avoids vector integer div/rem.
    col = pos_f32 - jnp.floor(pos_f32 / w_pad) * w_pad
    return col < width


# ---------------- fused path: whole sample resident in VMEM ----------------
def _fused_kernel(xf_ref, w_ref, o_ref, *, kernel_size, w_pad, width, out_len, inv_hw):
    # xf_ref: (Cin, L)  bf16 flattened reflect-padded sample (L = Hp*Wp)
    # w_ref : (K*K, Cout_pad, Cin) bf16 -- one matrix per kernel tap
    # o_ref : (Cout_pad, FL) out dtype; only [:, :out_len] is written (pad columns of
    #         the last row are dropped by the wrapper).
    K = kernel_size
    cout = o_ref.shape[0]

    # conv = sum over taps of shifted (Cout_pad, Cin) @ (Cin, out_len) matmuls
    acc = jnp.zeros((cout, out_len), jnp.float32)
    for ky in range(K):
        for kx in range(K):
            s = ky * w_pad + kx
            acc += jnp.dot(w_ref[ky * K + kx], xf_ref[:, s:s + out_len],
                           preferred_element_type=jnp.float32)

    # mask out horizontal reflect-pad columns for the InstanceNorm statistics
    pos = lax.broadcasted_iota(jnp.int32, (1, out_len), 1).astype(jnp.float32)
    valid = _valid_col_mask(pos, w_pad, width)

    yv = jnp.where(valid, acc, 0.0)
    mean = jnp.sum(yv, axis=1, keepdims=True) * inv_hw
    d = jnp.where(valid, acc - mean, 0.0)                # centered variance (stable)
    var = jnp.sum(d * d, axis=1, keepdims=True) * inv_hw
    o_ref[:, :out_len] = (
        jnp.maximum((acc - mean) * lax.rsqrt(var + EPS), 0.0).astype(o_ref.dtype))


# ------------- two-pass fallback: pass 1 = conv + streaming stats ----------
def _conv_stats_kernel(xb_ref, w_ref, y_ref, sum_ref, ssq_ref, *,
                       kernel_size, w_pad, width, tile, total_len):
    # xb_ref: (Cin, tile+halo) bf16 overlapping band  w_ref: (K*K, Cout_pad, Cin) bf16
    # y_ref : (Cout_pad, tile) bf16                   sum/ssq: (Cout_pad, 1) f32 accums
    K = kernel_size
    t = pl.program_id(1)

    @pl.when(t == 0)
    def _():
        sum_ref[...] = jnp.zeros_like(sum_ref)
        ssq_ref[...] = jnp.zeros_like(ssq_ref)

    cout = y_ref.shape[0]
    acc = jnp.zeros((cout, tile), jnp.float32)
    for ky in range(K):
        for kx in range(K):
            s = ky * w_pad + kx
            acc += jnp.dot(w_ref[ky * K + kx], xb_ref[:, s:s + tile],
                           preferred_element_type=jnp.float32)

    pos_i = t * tile + lax.broadcasted_iota(jnp.int32, (1, tile), 1)
    valid = _valid_col_mask(pos_i.astype(jnp.float32), w_pad, width) & (pos_i < total_len)

    yv = jnp.where(valid, acc, 0.0)
    sum_ref[...] += jnp.sum(yv, axis=1, keepdims=True)
    ssq_ref[...] += jnp.sum(yv * yv, axis=1, keepdims=True)
    y_ref[...] = acc.astype(y_ref.dtype)                 # bf16 intermediate (perf item)


# ------------- two-pass fallback: pass 2 = normalize + ReLU ----------------
def _norm_relu_kernel(y_ref, sum_ref, ssq_ref, o_ref, *, inv_hw):
    mean = sum_ref[...] * inv_hw
    var = ssq_ref[...] * inv_hw - mean * mean            # biased variance (PyTorch IN)
    scale = lax.rsqrt(var + EPS)
    y = y_ref[...].astype(jnp.float32)
    o_ref[...] = jnp.maximum((y - mean) * scale, 0.0).astype(o_ref.dtype)


def conv_block_forward(x, weight, bias=None, *, kernel_size=3, padding=1,
                       force_two_pass=False, max_tile=None):
    """ConvBlock forward (down=True, use_act=True, stride=1).

    x: (N, Cin, H, W); weight: (Cout, Cin, K, K); bias is unused -- it is cancelled
    exactly by InstanceNorm2d(affine=False)'s mean subtraction.  Returns (N, Cout, H, W).
    """
    del bias
    N, Cin, H, W = x.shape
    Cout = weight.shape[0]
    K = kernel_size
    KK = K * K
    Hp, Wp = H + 2 * padding, W + 2 * padding
    L = Hp * Wp                     # flattened padded-sample length
    FL = H * Wp                     # all output rows laid on the padded-width grid
    OL = (H - 1) * Wp + W           # last valid flat output position + 1
    HW = H * W
    Cout_pad = _round_up(Cout, 8)
    inv_hw = 1.0 / HW
    itemsize = jnp.dtype(x.dtype).itemsize
    budget, vmem_limit = _vmem_budget()

    # Reflect pad in bf16 (halves conv-input HBM traffic), flatten spatial dims (free).
    xpf = jnp.pad(x.astype(jnp.bfloat16),
                  ((0, 0), (0, 0), (padding, padding), (padding, padding)),
                  mode="reflect").reshape(N, Cin, L)

    # One (Cout_pad, Cin) bf16 matrix per kernel tap: w_taps[ky*K+kx, co, ci].
    w_taps = jnp.pad(weight.astype(jnp.bfloat16),
                     ((0, Cout_pad - Cout), (0, 0), (0, 0), (0, 0)))
    w_taps = jnp.transpose(w_taps, (2, 3, 0, 1)).reshape(KK, Cout_pad, Cin)

    # ---- path selection: fully fused per sample vs two-pass spatially tiled ----
    fused_bytes = (2 * Cin * L * 2                  # double-buffered bf16 input
                   + 2 * KK * Cout_pad * Cin * 2    # weights
                   + 2 * Cout_pad * FL * itemsize   # double-buffered output
                   + 4 * Cout_pad * OL * 4          # f32 acc + masked/centered temps
                   + 2 * Cin * OL * 2)              # shifted-slice temporaries
    use_fused = (not force_two_pass) and fused_bytes <= budget

    if use_fused:
        out_flat = pl.pallas_call(
            functools.partial(_fused_kernel, kernel_size=K, w_pad=Wp, width=W,
                              out_len=OL, inv_hw=inv_hw),
            out_shape=jax.ShapeDtypeStruct((N, Cout_pad, FL), x.dtype),
            grid_spec=pltpu.PrefetchScalarGridSpec(
                num_scalar_prefetch=0,
                grid=(N,),
                in_specs=[
                    pl.BlockSpec((None, Cin, L), lambda n: (n, 0, 0)),
                    pl.BlockSpec((KK, Cout_pad, Cin), lambda n: (0, 0, 0)),
                ],
                out_specs=pl.BlockSpec((None, Cout_pad, FL), lambda n: (n, 0, 0)),
            ),
            compiler_params=pltpu.CompilerParams(
                dimension_semantics=("parallel",),
                vmem_limit_bytes=vmem_limit),
        )(xpf, w_taps)
    else:
        # -------- pass 1: conv (shifted matmuls) + streaming per-channel stats -----
        halo = (K - 1) * Wp + (K - 1)               # maximum tap shift
        per_pos = 2 * Cin * 2 + 2 * Cout_pad * 2 + 3 * Cout_pad * 4
        fixed = 2 * Cin * halo * 2 + 2 * KK * Cout_pad * Cin * 2 + 4 * Cout_pad * 4
        cap = max((budget - fixed) // per_pos, 128)
        if max_tile is not None:
            cap = min(cap, max_tile)
        T = max(min(_round_up(FL, 128), cap // 128 * 128), 128)
        FLp = _round_up(FL, T)
        num_t = FLp // T

        # Overlapping row bands built once in XLA (~(T+halo)/T of input, not 9x im2col).
        ext = FLp + halo - L
        xpf_ext = jnp.pad(xpf, ((0, 0), (0, 0), (0, ext)))
        xband = jnp.stack([xpf_ext[:, :, t * T: t * T + T + halo]
                           for t in range(num_t)], axis=1)   # (N, num_t, Cin, T+halo)

        y, ssum, ssq = pl.pallas_call(
            functools.partial(_conv_stats_kernel, kernel_size=K, w_pad=Wp, width=W,
                              tile=T, total_len=FL),
            out_shape=(
                jax.ShapeDtypeStruct((N, Cout_pad, FLp), jnp.bfloat16),
                jax.ShapeDtypeStruct((N, Cout_pad, 1), jnp.float32),
                jax.ShapeDtypeStruct((N, Cout_pad, 1), jnp.float32),
            ),
            grid_spec=pltpu.PrefetchScalarGridSpec(
                num_scalar_prefetch=0,
                grid=(N, num_t),
                in_specs=[
                    pl.BlockSpec((None, None, Cin, T + halo),
                                 lambda n, t: (n, t, 0, 0)),
                    pl.BlockSpec((KK, Cout_pad, Cin), lambda n, t: (0, 0, 0)),
                ],
                out_specs=(
                    pl.BlockSpec((None, Cout_pad, T), lambda n, t: (n, 0, t)),
                    pl.BlockSpec((None, Cout_pad, 1), lambda n, t: (n, 0, 0)),
                    pl.BlockSpec((None, Cout_pad, 1), lambda n, t: (n, 0, 0)),
                ),
            ),
            compiler_params=pltpu.CompilerParams(
                dimension_semantics=("parallel", "arbitrary"),
                vmem_limit_bytes=vmem_limit),
        )(xband, w_taps)

        # -------- pass 2: normalize + ReLU, largest lane-dense block that fits -----
        per_pos2 = 2 * Cout_pad * 2 + 2 * Cout_pad * itemsize + 2 * Cout_pad * 4
        cap2 = max((budget - 4 * Cout_pad * 4) // per_pos2, 128)
        k = 1
        for d in range(1, num_t + 1):
            if num_t % d == 0 and d * T <= cap2:
                k = d
        T2 = k * T
        num_t2 = FLp // T2

        out_flat = pl.pallas_call(
            functools.partial(_norm_relu_kernel, inv_hw=inv_hw),
            out_shape=jax.ShapeDtypeStruct((N, Cout_pad, FLp), x.dtype),
            grid_spec=pltpu.PrefetchScalarGridSpec(
                num_scalar_prefetch=0,
                grid=(N, num_t2),
                in_specs=[
                    pl.BlockSpec((None, Cout_pad, T2), lambda n, t: (n, 0, t)),
                    pl.BlockSpec((None, Cout_pad, 1), lambda n, t: (n, 0, 0)),
                    pl.BlockSpec((None, Cout_pad, 1), lambda n, t: (n, 0, 0)),
                ],
                out_specs=pl.BlockSpec((None, Cout_pad, T2), lambda n, t: (n, 0, t)),
            ),
            compiler_params=pltpu.CompilerParams(
                dimension_semantics=("parallel", "parallel"),
                vmem_limit_bytes=vmem_limit),
        )(y, ssum, ssq)

    # Rows are already in NCHW order on the padded-width grid: free reshape, then one
    # strided slice drops the horizontal reflect-pad columns (and any channel padding).
    # No-op copy when padding == 0 and Cout_pad == Cout.
    out = out_flat[:, :, :FL].reshape(N, Cout_pad, H, Wp)
    return out[:, :Cout, :, :W]


if __name__ == "__main__":
    key = jax.random.PRNGKey(0)
    k_x, k_w, k_b = jax.random.split(key, 3)

    # ConvBlock(in_channels=4, out_channels=8, down=True, use_act=True,
    #           kernel_size=3, padding=1, stride=1)
    N, Cin, H, W = 2, 4, 16, 16
    Cout, K = 8, 3

    x = jax.random.normal(k_x, (N, Cin, H, W), dtype=jnp.float32)
    weight = jax.random.normal(k_w, (Cout, Cin, K, K), dtype=jnp.float32) * 0.1
    bias = jax.random.normal(k_b, (Cout,), dtype=jnp.float32) * 0.1

    # Fused per-sample-resident path.
    y_fused = conv_block_forward(x, weight, bias, kernel_size=K, padding=1)
    # Two-pass tiled fallback path (forced, 128-wide tiles -> 3 tiles per sample).
    y_tiled = conv_block_forward(x, weight, bias, kernel_size=K, padding=1,
                                 force_two_pass=True, max_tile=128)
    jax.block_until_ready((y_fused, y_tiled))

    # Pure-JAX f32 reference (same semantics as the PyTorch module; the conv bias is
    # cancelled exactly by InstanceNorm's mean subtraction).
    xp = jnp.pad(x, ((0, 0), (0, 0), (1, 1), (1, 1)), mode="reflect")
    ref_conv = lax.conv_general_dilated(
        xp, weight, window_strides=(1, 1), padding="VALID",
        dimension_numbers=("NCHW", "OIHW", "NCHW")) + bias.reshape(1, Cout, 1, 1)
    mean = ref_conv.mean(axis=(2, 3), keepdims=True)
    var = ((ref_conv - mean) ** 2).mean(axis=(2, 3), keepdims=True)
    ref = jnp.maximum((ref_conv - mean) * lax.rsqrt(var + EPS), 0.0)

    assert y_fused.shape == (N, Cout, H, W)
    assert y_tiled.shape == (N, Cout, H, W)
    # bf16 MXU operands (f32 accumulate) -> loosened tolerance vs the f32 reference.
    assert jnp.allclose(y_fused, ref, atol=3e-2, rtol=3e-2), "fused path mismatch"
    assert jnp.allclose(y_tiled, ref, atol=3e-2, rtol=3e-2), "tiled path mismatch"
    assert jnp.allclose(y_fused, y_tiled, atol=2e-2, rtol=2e-2), "path divergence"

    print("KERNEL_OK")
</pallas_src>

<mosaic_0001>
module attributes {stable_mosaic.version = 11 : i64} {
  func.func @_fused_kernel(%arg0: i32, %arg1: memref<1x4x324xbf16, #tpu.memory_space<vmem>>, %arg2: memref<9x8x4xbf16, #tpu.memory_space<vmem>>, %arg3: memref<1x8x288xf32, #tpu.memory_space<vmem>>) attributes {dimension_semantics = [#tpu.dimension_semantics<parallel>], iteration_bounds = array<i64: 2>, scalar_prefetch = 0 : i64, scratch_operands = 0 : i64, tpu.core_type = #tpu.core_type<tc>, window_params = [{transform_indices = @transform_0, window_bounds = array<i64: 1, 4, 324>}, {pipeline_mode = #tpu.pipeline_mode<synchronous>, transform_indices = @transform_1, window_bounds = array<i64: 9, 8, 4>}, {transform_indices = @transform_2, window_bounds = array<i64: 1, 8, 288>}]} {
    %cst = arith.constant 0.000000e+00 : f32
    %0 = vector.broadcast %cst : f32 to vector<8x286xf32>
    %c0 = arith.constant 0 : index
    %c0_0 = arith.constant 0 : index
    %c0_1 = arith.constant 0 : index
    %1 = vector.load %arg2[%c0, %c0_0, %c0_1] : memref<9x8x4xbf16, #tpu.memory_space<vmem>>, vector<1x8x4xbf16>
    %2 = vector.shape_cast %1 : vector<1x8x4xbf16> to vector<8x4xbf16>
    %c0_2 = arith.constant 0 : index
    %c0_3 = arith.constant 0 : index
    %c0_4 = arith.constant 0 : index
    %3 = vector.load %arg1[%c0_2, %c0_3, %c0_4] : memref<1x4x324xbf16, #tpu.memory_space<vmem>>, vector<1x4x286xbf16>
    %4 = vector.shape_cast %3 : vector<1x4x286xbf16> to vector<4x286xbf16>
    %cst_5 = arith.constant dense<0.000000e+00> : vector<8x286xf32>
    %5 = tpu.matmul %2, %4, %cst_5 {dimension_numbers = #tpu.dot_dimension_numbers<[1], [0], [0], [1], [0, 0, 1, 1], [], []>} : vector<8x4xbf16>, vector<4x286xbf16>, vector<8x286xf32> -> vector<8x286xf32>
    %6 = arith.addf %0, %5 : vector<8x286xf32>
    %c1 = arith.constant 1 : index
    %c0_6 = arith.constant 0 : index
    %c0_7 = arith.constant 0 : index
    %7 = vector.load %arg2[%c1, %c0_6, %c0_7] : memref<9x8x4xbf16, #tpu.memory_space<vmem>>, vector<1x8x4xbf16>
    %8 = vector.shape_cast %7 : vector<1x8x4xbf16> to vector<8x4xbf16>
    %c0_8 = arith.constant 0 : index
    %c0_9 = arith.constant 0 : index
    %c1_10 = arith.constant 1 : index
    %9 = vector.load %arg1[%c0_8, %c0_9, %c1_10] : memref<1x4x324xbf16, #tpu.memory_space<vmem>>, vector<1x4x286xbf16>
    %10 = vector.shape_cast %9 : vector<1x4x286xbf16> to vector<4x286xbf16>
    %cst_11 = arith.constant dense<0.000000e+00> : vector<8x286xf32>
    %11 = tpu.matmul %8, %10, %cst_11 {dimension_numbers = #tpu.dot_dimension_numbers<[1], [0], [0], [1], [0, 0, 1, 1], [], []>} : vector<8x4xbf16>, vector<4x286xbf16>, vector<8x286xf32> -> vector<8x286xf32>
    %12 = arith.addf %6, %11 : vector<8x286xf32>
    %c2 = arith.constant 2 : index
    %c0_12 = arith.constant 0 : index
    %c0_13 = arith.constant 0 : index
    %13 = vector.load %arg2[%c2, %c0_12, %c0_13] : memref<9x8x4xbf16, #tpu.memory_space<vmem>>, vector<1x8x4xbf16>
    %14 = vector.shape_cast %13 : vector<1x8x4xbf16> to vector<8x4xbf16>
    %c0_14 = arith.constant 0 : index
    %c0_15 = arith.constant 0 : index
    %c2_16 = arith.constant 2 : index
    %15 = vector.load %arg1[%c0_14, %c0_15, %c2_16] : memref<1x4x324xbf16, #tpu.memory_space<vmem>>, vector<1x4x286xbf16>
    %16 = vector.shape_cast %15 : vector<1x4x286xbf16> to vector<4x286xbf16>
    %cst_17 = arith.constant dense<0.000000e+00> : vector<8x286xf32>
    %17 = tpu.matmul %14, %16, %cst_17 {dimension_numbers = #tpu.dot_dimension_numbers<[1], [0], [0], [1], [0, 0, 1, 1], [], []>} : vector<8x4xbf16>, vector<4x286xbf16>, vector<8x286xf32> -> vector<8x286xf32>
    %18 = arith.addf %12, %17 : vector<8x286xf32>
    %c3 = arith.constant 3 : index
    %c0_18 = arith.constant 0 : index
    %c0_19 = arith.constant 0 : index
    %19 = vector.load %arg2[%c3, %c0_18, %c0_19] : memref<9x8x4xbf16, #tpu.memory_space<vmem>>, vector<1x8x4xbf16>
    %20 = vector.shape_cast %19 : vector<1x8x4xbf16> to vector<8x4xbf16>
    %c0_20 = arith.constant 0 : index
    %c0_21 = arith.constant 0 : index
    %c18 = arith.constant 18 : index
    %21 = vector.load %arg1[%c0_20, %c0_21, %c18] : memref<1x4x324xbf16, #tpu.memory_space<vmem>>, vector<1x4x286xbf16>
    %22 = vector.shape_cast %21 : vector<1x4x286xbf16> to vector<4x286xbf16>
    %cst_22 = arith.constant dense<0.000000e+00> : vector<8x286xf32>
    %23 = tpu.matmul %20, %22, %cst_22 {dimension_numbers = #tpu.dot_dimension_numbers<[1], [0], [0], [1], [0, 0, 1, 1], [], []>} : vector<8x4xbf16>, vector<4x286xbf16>, vector<8x286xf32> -> vector<8x286xf32>
    %24 = arith.addf %18, %23 : vector<8x286xf32>
    %c4 = arith.constant 4 : index
    %c0_23 = arith.constant 0 : index
    %c0_24 = arith.constant 0 : index
    %25 = vector.load %arg2[%c4, %c0_23, %c0_24] : memref<9x8x4xbf16, #tpu.memory_space<vmem>>, vector<1x8x4xbf16>
    %26 = vector.shape_cast %25 : vector<1x8x4xbf16> to vector<8x4xbf16>
    %c0_25 = arith.constant 0 : index
    %c0_26 = arith.constant 0 : index
    %c19 = arith.constant 19 : index
    %27 = vector.load %arg1[%c0_25, %c0_26, %c19] : memref<1x4x324xbf16, #tpu.memory_space<vmem>>, vector<1x4x286xbf16>
    %28 = vector.shape_cast %27 : vector<1x4x286xbf16> to vector<4x286xbf16>
    %cst_27 = arith.constant dense<0.000000e+00> : vector<8x286xf32>
    %29 = tpu.matmul %26, %28, %cst_27 {dimension_numbers = #tpu.dot_dimension_numbers<[1], [0], [0], [1], [0, 0, 1, 1], [], []>} : vector<8x4xbf16>, vector<4x286xbf16>, vector<8x286xf32> -> vector<8x286xf32>
    %30 = arith.addf %24, %29 : vector<8x286xf32>
    %c5 = arith.constant 5 : index
    %c0_28 = arith.constant 0 : index
    %c0_29 = arith.constant 0 : index
    %31 = vector.load %arg2[%c5, %c0_28, %c0_29] : memref<9x8x4xbf16, #tpu.memory_space<vmem>>, vector<1x8x4xbf16>
    %32 = vector.shape_cast %31 : vector<1x8x4xbf16> to vector<8x4xbf16>
    %c0_30 = arith.constant 0 : index
    %c0_31 = arith.constant 0 : index
    %c20 = arith.constant 20 : index
    %33 = vector.load %arg1[%c0_30, %c0_31, %c20] : memref<1x4x324xbf16, #tpu.memory_space<vmem>>, vector<1x4x286xbf16>
    %34 = vector.shape_cast %33 : vector<1x4x286xbf16> to vector<4x286xbf16>
    %cst_32 = arith.constant dense<0.000000e+00> : vector<8x286xf32>
    %35 = tpu.matmul %32, %34, %cst_32 {dimension_numbers = #tpu.dot_dimension_numbers<[1], [0], [0], [1], [0, 0, 1, 1], [], []>} : vector<8x4xbf16>, vector<4x286xbf16>, vector<8x286xf32> -> vector<8x286xf32>
    %36 = arith.addf %30, %35 : vector<8x286xf32>
    %c6 = arith.constant 6 : index
    %c0_33 = arith.constant 0 : index
    %c0_34 = arith.constant 0 : index
    %37 = vector.load %arg2[%c6, %c0_33, %c0_34] : memref<9x8x4xbf16, #tpu.memory_space<vmem>>, vector<1x8x4xbf16>
    %38 = vector.shape_cast %37 : vector<1x8x4xbf16> to vector<8x4xbf16>
    %c0_35 = arith.constant 0 : index
    %c0_36 = arith.constant 0 : index
    %c36 = arith.constant 36 : index
    %39 = vector.load %arg1[%c0_35, %c0_36, %c36] : memref<1x4x324xbf16, #tpu.memory_space<vmem>>, vector<1x4x286xbf16>
    %40 = vector.shape_cast %39 : vector<1x4x286xbf16> to vector<4x286xbf16>
    %cst_37 = arith.constant dense<0.000000e+00> : vector<8x286xf32>
    %41 = tpu.matmul %38, %40, %cst_37 {dimension_numbers = #tpu.dot_dimension_numbers<[1], [0], [0], [1], [0, 0, 1, 1], [], []>} : vector<8x4xbf16>, vector<4x286xbf16>, vector<8x286xf32> -> vector<8x286xf32>
    %42 = arith.addf %36, %41 : vector<8x286xf32>
    %c7 = arith.constant 7 : index
    %c0_38 = arith.constant 0 : index
    %c0_39 = arith.constant 0 : index
    %43 = vector.load %arg2[%c7, %c0_38, %c0_39] : memref<9x8x4xbf16, #tpu.memory_space<vmem>>, vector<1x8x4xbf16>
    %44 = vector.shape_cast %43 : vector<1x8x4xbf16> to vector<8x4xbf16>
    %c0_40 = arith.constant 0 : index
    %c0_41 = arith.constant 0 : index
    %c37 = arith.constant 37 : index
    %45 = vector.load %arg1[%c0_40, %c0_41, %c37] : memref<1x4x324xbf16, #tpu.memory_space<vmem>>, vector<1x4x286xbf16>
    %46 = vector.shape_cast %45 : vector<1x4x286xbf16> to vector<4x286xbf16>
    %cst_42 = arith.constant dense<0.000000e+00> : vector<8x286xf32>
    %47 = tpu.matmul %44, %46, %cst_42 {dimension_numbers = #tpu.dot_dimension_numbers<[1], [0], [0], [1], [0, 0, 1, 1], [], []>} : vector<8x4xbf16>, vector<4x286xbf16>, vector<8x286xf32> -> vector<8x286xf32>
    %48 = arith.addf %42, %47 : vector<8x286xf32>
    %c8 = arith.constant 8 : index
    %c0_43 = arith.constant 0 : index
    %c0_44 = arith.constant 0 : index
    %49 = vector.load %arg2[%c8, %c0_43, %c0_44] : memref<9x8x4xbf16, #tpu.memory_space<vmem>>, vector<1x8x4xbf16>
    %50 = vector.shape_cast %49 : vector<1x8x4xbf16> to vector<8x4xbf16>
    %c0_45 = arith.constant 0 : index
    %c0_46 = arith.constant 0 : index
    %c38 = arith.constant 38 : index
    %51 = vector.load %arg1[%c0_45, %c0_46, %c38] : memref<1x4x324xbf16, #tpu.memory_space<vmem>>, vector<1x4x286xbf16>
    %52 = vector.shape_cast %51 : vector<1x4x286xbf16> to vector<4x286xbf16>
    %cst_47 = arith.constant dense<0.000000e+00> : vector<8x286xf32>
    %53 = tpu.matmul %50, %52, %cst_47 {dimension_numbers = #tpu.dot_dimension_numbers<[1], [0], [0], [1], [0, 0, 1, 1], [], []>} : vector<8x4xbf16>, vector<4x286xbf16>, vector<8x286xf32> -> vector<8x286xf32>
    %54 = arith.addf %48, %53 : vector<8x286xf32>
    %55 = tpu.iota {dimensions = array<i32: 1>} : vector<1x286xi32>
    %56 = arith.sitofp %55 : vector<1x286xi32> to vector<1x286xf32>
    %cst_48 = arith.constant 1.800000e+01 : f32
    %57 = vector.broadcast %cst_48 : f32 to vector<1x286xf32>
    %58 = arith.divf %56, %57 : vector<1x286xf32>
    %59 = math.floor %58 : vector<1x286xf32>
    %cst_49 = arith.constant 1.800000e+01 : f32
    %60 = vector.broadcast %cst_49 : f32 to vector<1x286xf32>
    %61 = arith.mulf %59, %60 : vector<1x286xf32>
    %62 = arith.subf %56, %61 : vector<1x286xf32>
    %cst_50 = arith.constant 1.600000e+01 : f32
    %63 = vector.broadcast %cst_50 : f32 to vector<1x286xf32>
    %64 = arith.cmpf olt, %62, %63 : vector<1x286xf32>
    %cst_51 = arith.constant 0.000000e+00 : f32
    %65 = vector.shape_cast %64 : vector<1x286xi1> to vector<1x286xi1>
    %66 = vector.broadcast %65 : vector<1x286xi1> to vector<8x286xi1>
    %67 = vector.broadcast %cst_51 : f32 to vector<8x286xf32>
    %68 = arith.select %66, %54, %67 : vector<8x286xi1>, vector<8x286xf32>
    %cst_52 = arith.constant dense<0.000000e+00> : vector<8xf32>
    %69 = vector.multi_reduction <add>, %68, %cst_52 [1] : vector<8x286xf32> to vector<8xf32>
    %70 = vector.shape_cast %69 : vector<8xf32> to vector<8x1xf32>
    %cst_53 = arith.constant 3.906250e-03 : f32
    %71 = vector.broadcast %cst_53 : f32 to vector<8x1xf32>
    %72 = arith.mulf %70, %71 : vector<8x1xf32>
    %73 = vector.broadcast %72 : vector<8x1xf32> to vector<8x286xf32>
    %74 = arith.subf %54, %73 : vector<8x286xf32>
    %cst_54 = arith.constant 0.000000e+00 : f32
    %75 = vector.shape_cast %64 : vector<1x286xi1> to vector<1x286xi1>
    %76 = vector.broadcast %75 : vector<1x286xi1> to vector<8x286xi1>
    %77 = vector.broadcast %cst_54 : f32 to vector<8x286xf32>
    %78 = arith.select %76, %74, %77 : vector<8x286xi1>, vector<8x286xf32>
    %79 = arith.mulf %78, %78 : vector<8x286xf32>
    %cst_55 = arith.constant dense<0.000000e+00> : vector<8xf32>
    %80 = vector.multi_reduction <add>, %79, %cst_55 [1] : vector<8x286xf32> to vector<8xf32>
    %81 = vector.shape_cast %80 : vector<8xf32> to vector<8x1xf32>
    %cst_56 = arith.constant 3.906250e-03 : f32
    %82 = vector.broadcast %cst_56 : f32 to vector<8x1xf32>
    %83 = arith.mulf %81, %82 : vector<8x1xf32>
    %84 = vector.broadcast %72 : vector<8x1xf32> to vector<8x286xf32>
    %85 = arith.subf %54, %84 : vector<8x286xf32>
    %cst_57 = arith.constant 9.99999974E-6 : f32
    %86 = vector.broadcast %cst_57 : f32 to vector<8x1xf32>
    %87 = arith.addf %83, %86 : vector<8x1xf32>
    %88 = math.rsqrt %87 : vector<8x1xf32>
    %89 = vector.broadcast %88 : vector<8x1xf32> to vector<8x286xf32>
    %90 = arith.mulf %85, %89 : vector<8x286xf32>
    %cst_58 = arith.constant 0.000000e+00 : f32
    %91 = vector.broadcast %cst_58 : f32 to vector<8x286xf32>
    %92 = arith.maximumf %90, %91 : vector<8x286xf32>
    %c0_59 = arith.constant 0 : index
    %c0_60 = arith.constant 0 : index
    %c0_61 = arith.constant 0 : index
    %93 = vector.load %arg3[%c0_59, %c0_60, %c0_61] : memref<1x8x288xf32, #tpu.memory_space<vmem>>, vector<1x8x286xf32>
    %94 = vector.shape_cast %93 : vector<1x8x286xf32> to vector<8x286xf32>
    %95 = vector.shape_cast %92 : vector<8x286xf32> to vector<1x8x286xf32>
    tpu.vector_store %arg3[%c0_59, %c0_60, %c0_61], %95 {strides = array<i32>} : memref<1x8x288xf32, #tpu.memory_space<vmem>>, vector<1x8x286xf32>,
    return
  }
  func.func @transform_0(%arg0: i32) -> (i32, i32, i32) {
    %c0_i32 = arith.constant 0 : i32
    %c0_i32_0 = arith.constant 0 : i32
    %c0_i32_1 = arith.constant 0 : i32
    return %arg0, %c0_i32, %c0_i32_0 : i32, i32, i32
  }
  func.func @transform_1(%arg0: i32) -> (i32, i32, i32) {
    %c0_i32 = arith.constant 0 : i32
    %c0_i32_0 = arith.constant 0 : i32
    %c0_i32_1 = arith.constant 0 : i32
    %c0_i32_2 = arith.constant 0 : i32
    return %c0_i32, %c0_i32_0, %c0_i32_1 : i32, i32, i32
  }
  func.func @transform_2(%arg0: i32) -> (i32, i32, i32) {
    %c0_i32 = arith.constant 0 : i32
    %c0_i32_0 = arith.constant 0 : i32
    %c0_i32_1 = arith.constant 0 : i32
    return %arg0, %c0_i32, %c0_i32_0 : i32, i32, i32
  }
}

</mosaic_0001>

<bundles_post_ra>
// kernel: tpu_custom_call.1
= control target key start
LH: loop header
LB: loop body
LE: loop exit
PB: predicated region body
PF: predicated region fallthrough
CT: control target
= control target key end

     0   :  { %7 = vsyncpa [#allocation3], 0  ;;  %s1909_s0 = inlined_call_operand.vmem [shape: bf16[2,4,324], index: 0, kind: input, shape index: {}]   ;;  %s1910_s1 = inlined_call_operand.vmem [shape: bf16[9,8,4], index: 1, kind: input, shape index: {}]   ;;  %s1911_s2 = inlined_call_operand.hbm [shape: f32[2,8,288], index: 2, kind: output, shape index: {}]  }
   0x1   :  { %9 = vsyncpa [#allocation3 + $0x1], 0  ;;  %s1644_s9 = smov 0   ;;  %s1646_s10 = smov 0  }
   0x2   :  { %s1648_s11 = smov 0   ;;  %s1650_s12 = smov 0  }
   0x3 LB: > { %s1665_s13 = sadd.s32 4294967295, %s1614_s12   ;;  %s1375_s14 = sadd.s32 4294967294, %s1614_s12   ;;  %s1614_s12 = sphi %s1650_s12, %s1917_s12   ;;  %s1610_s11 = sphi %s1648_s11, %s1916_s11   ;;  %s1606_s10 = sphi %s1646_s10, %s1915_s10   ;;  %s1602_s9 = sphi %s1644_s9, %s1914_s9  }
   0x4   : > { %s1669_s15 = sadd.s32 1, %s1614_s12   ;;  %s69_s16 = sadd.s32 1, %s1610_s11 }
   0x5   : > { %s66_s17 = ssub.s32 %s1614_s12, %s1669_s15  ;;  %p79_p0 = scmp.ne.s32.totalorder %s1610_s11, %s1606_s10 }
   0x6   : > { %p67_p1 = scmp.eq.s32.totalorder %s66_s17, 0  ;;  %p80_p2 = scmp.eq.s32.totalorder %s1665_s13, 1 }
   0x7   : > { %p85_p3 = scmp.ne.s32.totalorder %s1606_s10, %s1602_s9  ;;  %p86_p4 = scmp.eq.s32.totalorder %s1375_s14, 1 }
   0x8   : > { %s1680_s18 = scalar_select %p67_p1, %s1610_s11, %s69_s16  }
   0x9   : > { %p1682_p5 = por %p80_p2, %p79_p0  ;;  %p1686_p6 = por %p86_p4, %p85_p3 }
   0xa   : > { %p1378_p7 = scmp.ge.s32.totalorder %s1614_s12, 1  ;;  %p115_p8 = scmp.lt.s32.totalorder %s1614_s12, 3 }
   0xc   : > { %p116_p9 = pnand %p1378_p7, %p115_p8 }
   0xd   : > { %p137_p10 = scmp.lt.s32.totalorder (!%p116_p9), %s1665_s13, 1  ;;  %s1620_s26 = smov (!%p116_p9), 127  }
   0xe   : > { %119 = sbr.rel (%p116_p9) target bundleno = 741 (0x2e5), region = 28  ;;  %s1621_s27 = smov (!%p116_p9), 126  }
   0xf   : > { %s1622_s28 = smov (!%p116_p9), 110   ;;  %s1623_s29 = smov (!%p116_p9), 109  }
  0x10   : > { %s1624_s30 = smov (!%p116_p9), 108   ;;  %s1625_s3 = smov (!%p116_p9), 92  }
  0x11   : > { %s1626_s4 = smov (!%p116_p9), 91   ;;  %s1627_s5 = smov (!%p116_p9), 90  }
  0x12   : > { %s1492_s7 = smul.u32 (!%p116_p9), 384, %s1665_s13  ;;  %s1628_s23 = smov (!%p116_p9), [#allocation2]  }
  0x13   : > { %v152_v0 = vlaneseq  ;;  %v1616_v1 = vmov 1983009808   ;;  %v1617_v3 = vmov 0.0   ;;  %s138_s21 = scalar_select %p137_p10, %s1665_s13, 1  ;;  %vm1618_vm0 = vmmov 0  }
  0x14   : > { %v150_v2 = vunpack.c.l.s4 %v1616_v1  ;;  %1436 = vmatprep.subr.bf16.mxu1 %v1617_v3  ;;  %1438 = vmatprep.mubr.msk.bf16.mxu1 %vm1618_vm0, %v1617_v3  ;;  %v1619_v6 = vmov 0   ;;  %vm177_vm1 = vcmask 1041408   ;;  %vm170_vm2 = vcmask 1039360   ;;  %v1380_v52 = vld [vmem:[%s1910_s1 + $0x4] sm:$0xf]  ;;  %s1558_s24 = sshll.u32 %s1628_s23, 4  ;;  %s1559_s24 = int_to_ptr.vmem [resolvable:$false] %s1558_s24 }
  0x15   : > { %v153_v4 = vshrl.u32 %v152_v0, 7  ;;  %s1491_s22 = smul.u32 6, %s138_s21  ;;  %219 = vmatprep.mubr.bf16.mxu0 %v1619_v6  ;;  %vm173_vm3 = vcmask 31744   ;;  %vm387_vm4 = vcmask 1031168   ;;  %v143_v62 = vld [vmem:[%s1910_s1] sm:$0xf]  ;;  %s1867_s21 = scalar_lea.hbm %s1911_s2, %s1492_s7 }
  0x16   : > { %v151_v5 = vunpack.c.0.s8 %v150_v2  ;;  %vm512_vm5 = vcmask 900096   ;;  %vm637_vm6 = vcmask 891904   ;;  %vm762_vm7 = vcmask 883712  }
  0x17   : > { %s1704_s25 = scalar_lea.vmem %s1909_s0, %s1491_s22  ;;  %vm887_vm8 = vcmask 752640   ;;  %vm1012_vm9 = vcmask 744448   ;;  %vm1137_vm10 = vcmask 736256   ;;  %vm1269_vm14 = vcmask 244736  }
  0x18   : > { %v1699_v7 = vsub.s32 %v151_v5, %v153_v4  ;;  %v144_v8 = vld [vmem:[%s1704_s25] sm:$0x3f] }
  0x19   : > { %v148_v10 = vcombine.high %v144_v8, %v144_v8  ;;  %v363_v11 = vld [vmem:[%s1704_s25] sm:$0x3f] }
  0x1a   : > { %v1708_v9 = vrot.slane %v144_v8, %v1699_v7  ;;  %v372_v14 = vrot.slane %v363_v11, %v1699_v7  ;;  %v365_v15 = vcombine.high %v363_v11, %v363_v11  ;;  %v488_v17 = vld [vmem:[%s1704_s25] sm:$0x3f] }
  0x1b   : > { %v1713_v12 = vrot.slane %v148_v10, %v1699_v7  ;;  %v497_v19 = vrot.slane %v488_v17, %v1699_v7  ;;  %v490_v20 = vcombine.high %v488_v17, %v488_v17  ;;  %v613_v22 = vld [vmem:[%s1704_s25] sm:$0x3f]  ;;  %v1387_v10 = vld [vmem:[%s1910_s1 + $0x8] sm:$0xf] }
  0x1c   : > { %164 = vrot.lane.b32.xlu0 %v1708_v9, %s1620_s26  ;;  %v1717_v13 = vcombine.high %v1708_v9, %v1708_v9  ;;  %v380_v16 = vcombine.high %v372_v14, %v372_v14  ;;  %v379_v18 = vrot.slane %v365_v15, %v1699_v7  ;;  %v622_v24 = vrot.slane %v613_v22, %v1699_v7  ;;  %v738_v27 = vld [vmem:[%s1704_s25] sm:$0x3f] }
  0x1d   : > { %168 = vrot.lane.b32.xlu1 %v1713_v12, %s1620_s26  ;;  %v505_v21 = vcombine.high %v497_v19, %v497_v19  ;;  %v504_v23 = vrot.slane %v490_v20, %v1699_v7  ;;  %v615_v25 = vcombine.high %v613_v22, %v613_v22  ;;  %v747_v29 = vrot.slane %v738_v27, %v1699_v7  ;;  %v863_v32 = vld [vmem:[%s1704_s25] sm:$0x3f] }
  0x1e   : > { %v630_v26 = vcombine.high %v622_v24, %v622_v24  ;;  %v740_v30 = vcombine.high %v738_v27, %v738_v27  ;;  %v872_v34 = vrot.slane %v863_v32, %v1699_v7  ;;  %v865_v35 = vcombine.high %v863_v32, %v863_v32  ;;  %v988_v37 = vld [vmem:[%s1704_s25] sm:$0x3f]  ;;  %v1395_v27 = vld [vmem:[%s1910_s1 + $0x10] sm:$0xf] }
  0x1f   : > { %v629_v28 = vrot.slane %v615_v25, %v1699_v7  ;;  %v755_v31 = vcombine.high %v747_v29, %v747_v29  ;;  %v997_v39 = vrot.slane %v988_v37, %v1699_v7  ;;  %v990_v40 = vcombine.high %v988_v37, %v988_v37  ;;  %v1113_v42 = vld [vmem:[%s1704_s25] sm:$0x3f]  ;;  %s1560_s25 = scalar_lea.vmem %s1559_s24, 768 }
  0x20   : > { %166 = vrot.lane.b32.xlu0 %v1717_v13, %s1620_s26  ;;  %v754_v33 = vrot.slane %v740_v30, %v1699_v7  ;;  %v880_v36 = vcombine.high %v872_v34, %v872_v34  ;;  %v879_v38 = vrot.slane %v865_v35, %v1699_v7  ;;  %v1122_v44 = vrot.slane %v1113_v42, %v1699_v7  ;;  %v1399_v35 = vld [vmem:[%s1910_s1 + $0x14] sm:$0xf] }
  0x21   : > { %381 = vrot.lane.b32.xlu1 %v372_v14, %s1621_s27  ;;  %v1005_v41 = vcombine.high %v997_v39, %v997_v39  ;;  %v1004_v43 = vrot.slane %v990_v40, %v1699_v7  ;;  %v1115_v45 = vcombine.high %v1113_v42, %v1113_v42  ;;  %v278_v55 = vsel %vm177_vm1, %v1713_v12, 0  ;;  %v1403_v42 = vld [vmem:[%s1910_s1 + $0x18] sm:$0xf] }
  0x22   : > { %v1130_v46 = vcombine.high %v1122_v44, %v1122_v44  ;;  %v272_v58 = vsel %vm177_vm1, %v1708_v9, 0 }
  0x23   : > { %v1129_v47 = vrot.slane %v1115_v45, %v1699_v7 }
  0x24   : > { %383 = vrot.lane.b32.xlu0 %v380_v16, %s1621_s27 }
  0x25   : > { %385 = vrot.lane.b32.xlu1 %v379_v18, %s1621_s27 }
  0x28   : > { %506 = vrot.lane.b32.xlu0 %v497_v19, %s1622_s28  ;;  %v1391_v19 = vld [vmem:[%s1910_s1 + $0xc] sm:$0xf] }
  0x29   : > { %508 = vrot.lane.b32.xlu1 %v505_v21, %s1622_s28 }
  0x2c   : > { %510 = vrot.lane.b32.xlu0 %v504_v23, %s1622_s28 }
  0x2d   : > { %631 = vrot.lane.b32.xlu1 %v622_v24, %s1623_s29 }
  0x30   : > { %633 = vrot.lane.b32.xlu0 %v630_v26, %s1623_s29 }
  0x31   : > { %635 = vrot.lane.b32.xlu1 %v629_v28, %s1623_s29 }
  0x34   : > { %756 = vrot.lane.b32.xlu0 %v747_v29, %s1624_s30 }
  0x35   : > { %758 = vrot.lane.b32.xlu1 %v755_v31, %s1624_s30 }
  0x38   : > { %760 = vrot.lane.b32.xlu0 %v754_v33, %s1624_s30 }
  0x39   : > { %881 = vrot.lane.b32.xlu1 %v872_v34, %s1625_s3 }
  0x3c   : > { %883 = vrot.lane.b32.xlu0 %v880_v36, %s1625_s3 }
  0x3d   : > { %885 = vrot.lane.b32.xlu1 %v879_v38, %s1625_s3 }
  0x40   : > { %1006 = vrot.lane.b32.xlu0 %v997_v39, %s1626_s4 }
  0x41   : > { %1008 = vrot.lane.b32.xlu1 %v1005_v41, %s1626_s4 }
  0x44   : > { %1010 = vrot.lane.b32.xlu0 %v1004_v43, %s1626_s4 }
  0x45   : > { %1131 = vrot.lane.b32.xlu1 %v1122_v44, %s1627_s5 }
  0x48   : > { %1133 = vrot.lane.b32.xlu0 %v1130_v46, %s1627_s5 }
  0x49   : > { %1135 = vrot.lane.b32.xlu1 %v1129_v47, %s1627_s5  ;;  %s134_s5 = sand.u32 1, %s1606_s10  }
  0x4a   : > { %s1490_s6 = smul.u32 24, %s134_s5  ;;  %s1302_s13 = scalar_lea.sflag [#allocation3], %s134_s5 }
  0x4c   : > { %s136_s8 = scalar_lea.vmem [#allocation2], %s1490_s6 }
  0x4d   : > { %s1316_s14 = sshll.u32 %s136_s8, 4  ;;  %s1869_s14 = int_to_ptr.vmem [resolvable:$true] %s1316_s14 }
  0x4e   : > { %s1554_s22 = scalar_lea.vmem %s1869_s14, 384  ;;  %p1561_p0 = scmp.lt.s32.totalorder %s1869_s14, %s1559_s24 }
  0x4f   : > { %p1555_p11 = scmp.ne.s32.totalorder %s1869_s14, %s1554_s22  ;;  %p1562_p1 = scmp.lt.s32.totalorder %s1560_s25, %s1554_s22 }
  0x51   : > { %p1556_p12 = pnand %p1555_p11, %p1682_p5  ;;  %p1563_p2 = por %p1562_p1, %p1561_p0 }
  0x53   : > { %p1557_p13 = pneg %p1556_p12 }
  0x55   : > { %p1564_p3 = pnand %p1563_p2, %p1557_p13 }
  0x8e   : > { %v165_v48 = vpop.permute.xlu0 %164 }
  0x8f   : > { %v169_v49 = vpop.permute.xlu1 %168 }
  0x90   : > { %v185_v50 = vsel %vm177_vm1, %v169_v49, 0 }
  0x91   : > { %1437 = vmatpush3.bf16.msra.mxu1 %v185_v50 }
  0x92   : > { %v167_v51 = vpop.permute.xlu0 %166  ;;  %1442 = vmatprep.subr.bf16.mxu1 %v1617_v3 }
  0x93   : > { %v172_v53 = vsel %vm170_vm2, %v167_v51, %v169_v49  ;;  %v171_v54 = vsel %vm170_vm2, %v165_v48, %v167_v51  ;;  %v382_v57 = vpop.permute.xlu1 %381  ;;  %v1407_v49 = vld [vmem:[%s1910_s1 + $0x1c] sm:$0xf] }
  0x94   : > { %1381 = vmatprep.subr.msk.bf16.mxu0 %vm177_vm1, %v172_v53  ;;  %v179_v56 = vsel %vm177_vm1, %v171_v54, 0  ;;  %1439 = vmatmul.mubr.msk.bf16.vlgmr.msra.gmra.mxu1 %vm173_vm3, %v1380_v52  ;;  %v1411_v53 = vld [vmem:[%s1910_s1 + $0x20] sm:$0xf] }
  0x95   : > { %202 = vmatpush1.bf16.msra.mxu0 %v179_v56  ;;  %1443 = vmatpush3.bf16.msra.mxu1 %v278_v55 }
  0x96   : > { %1384 = vmatprep.subr.msk.bf16.mxu0 %vm177_vm1, %v1717_v13  ;;  %v384_v59 = vpop.permute.xlu0 %383  ;;  %1444 = vmatprep.mubr.msk.bf16.mxu1 %vm1618_vm0, %v1617_v3 }
  0x97   : > { %1448 = vmatprep.subr.bf16.mxu1 %v1617_v3  ;;  %v386_v60 = vpop.permute.xlu1 %385  ;;  %v388_v1 = vsel %vm387_vm4, %v382_v57, %v384_v59 }
  0x98   : > { %1382 = vmatmul.mubr.msk.bf16.vlgmr.msra.gmra.mxu0 %vm173_vm3, %v1380_v52  ;;  %v389_v61 = vsel %vm387_vm4, %v384_v59, %v386_v60  ;;  %v400_v2 = vsel %vm177_vm1, %v386_v60, 0  ;;  %v394_v5 = vsel %vm177_vm1, %v388_v1, 0 }
  0x99   : > { %295 = vmatpush1.bf16.msra.mxu0 %v272_v58  ;;  %312 = vmatprep.mubr.bf16.mxu0 %v1619_v6 }
  0x9a   : > { %1388 = vmatprep.subr.msk.bf16.mxu0 %vm177_vm1, %v389_v61  ;;  %v507_v63 = vpop.permute.xlu0 %506 }
  0x9b   : > { %v509_v4 = vpop.permute.xlu1 %508 }
  0x9c   : > { %1445 = vmatmul.mubr.msk.bf16.vlgmr.msra.gmra.mxu1 %vm173_vm3, %v143_v62  ;;  %v513_v12 = vsel %vm512_vm5, %v507_v63, %v509_v4 }
  0x9d   : > { %1449 = vmatpush3.bf16.msra.mxu1 %v400_v2  ;;  %1450 = vmatprep.mubr.msk.bf16.mxu1 %vm1618_vm0, %v1617_v3  ;;  %v519_v15 = vsel %vm177_vm1, %v513_v12, 0 }
  0x9e   : > { %v511_v7 = vpop.permute.xlu0 %510  ;;  %1454 = vmatprep.subr.bf16.mxu1 %v1617_v3 }
  0x9f   : > { %v514_v8 = vsel %vm512_vm5, %v509_v4, %v511_v7  ;;  %v632_v9 = vpop.permute.xlu1 %631  ;;  %v525_v13 = vsel %vm177_vm1, %v511_v7, 0 }
  0xa0   : > { %1385 = vmatmul.mubr.msk.bf16.vlgmr.msra.gmra.mxu0 %vm173_vm3, %v143_v62 }
  0xa1   : > { %417 = vmatpush1.bf16.msra.mxu0 %v394_v5  ;;  %434 = vmatprep.mubr.bf16.mxu0 %v1619_v6 }
  0xa2   : > { %1392 = vmatprep.subr.msk.bf16.mxu0 %vm177_vm1, %v514_v8  ;;  %v634_v11 = vpop.permute.xlu0 %633 }
  0xa3   : > { %v636_v14 = vpop.permute.xlu1 %635  ;;  %v638_v20 = vsel %vm637_vm6, %v632_v9, %v634_v11 }
  0xa4   : > { %1451 = vmatmul.mubr.msk.bf16.vlgmr.msra.gmra.mxu1 %vm173_vm3, %v1387_v10  ;;  %v639_v17 = vsel %vm637_vm6, %v634_v11, %v636_v14  ;;  %v650_v21 = vsel %vm177_vm1, %v636_v14, 0  ;;  %v644_v23 = vsel %vm177_vm1, %v638_v20, 0 }
  0xa5   : > { %1455 = vmatpush3.bf16.msra.mxu1 %v525_v13  ;;  %1456 = vmatprep.mubr.msk.bf16.mxu1 %vm1618_vm0, %v1617_v3 }
  0xa6   : > { %v757_v16 = vpop.permute.xlu0 %756  ;;  %1460 = vmatprep.subr.bf16.mxu1 %v1617_v3 }
  0xa7   : > { %v759_v18 = vpop.permute.xlu1 %758 }
  0xa8   : > { %1389 = vmatmul.mubr.msk.bf16.vlgmr.msra.gmra.mxu0 %vm173_vm3, %v1387_v10  ;;  %v763_v28 = vsel %vm762_vm7, %v757_v16, %v759_v18 }
  0xa9   : > { %542 = vmatpush1.bf16.msra.mxu0 %v519_v15  ;;  %559 = vmatprep.mubr.bf16.mxu0 %v1619_v6  ;;  %v769_v31 = vsel %vm177_vm1, %v763_v28, 0 }
  0xaa   : > { %1396 = vmatprep.subr.msk.bf16.mxu0 %vm177_vm1, %v639_v17  ;;  %v761_v22 = vpop.permute.xlu0 %760 }
  0xab   : > { %v882_v24 = vpop.permute.xlu1 %881  ;;  %v764_v25 = vsel %vm762_vm7, %v759_v18, %v761_v22  ;;  %v775_v29 = vsel %vm177_vm1, %v761_v22, 0 }
  0xac   : > { %1457 = vmatmul.mubr.msk.bf16.vlgmr.msra.gmra.mxu1 %vm173_vm3, %v1391_v19 }
  0xad   : > { %1461 = vmatpush3.bf16.msra.mxu1 %v650_v21  ;;  %1462 = vmatprep.mubr.msk.bf16.mxu1 %vm1618_vm0, %v1617_v3 }
  0xae   : > { %1466 = vmatprep.subr.bf16.mxu1 %v1617_v3  ;;  %v884_v26 = vpop.permute.xlu0 %883 }
  0xaf   : > { %v886_v30 = vpop.permute.xlu1 %885  ;;  %v888_v36 = vsel %vm887_vm8, %v882_v24, %v884_v26 }
  0xb0   : > { %1393 = vmatmul.mubr.msk.bf16.vlgmr.msra.gmra.mxu0 %vm173_vm3, %v1391_v19  ;;  %v889_v33 = vsel %vm887_vm8, %v884_v26, %v886_v30  ;;  %v900_v37 = vsel %vm177_vm1, %v886_v30, 0  ;;  %v894_v39 = vsel %vm177_vm1, %v888_v36, 0 }
  0xb1   : > { %667 = vmatpush1.bf16.msra.mxu0 %v644_v23  ;;  %684 = vmatprep.mubr.bf16.mxu0 %v1619_v6 }
  0xb2   : > { %1400 = vmatprep.subr.msk.bf16.mxu0 %vm177_vm1, %v764_v25  ;;  %v1007_v32 = vpop.permute.xlu0 %1006 }
  0xb3   : > { %v1009_v34 = vpop.permute.xlu1 %1008 }
  0xb4   : > { %1463 = vmatmul.mubr.msk.bf16.vlgmr.msra.gmra.mxu1 %vm173_vm3, %v1395_v27  ;;  %v1013_v43 = vsel %vm1012_vm9, %v1007_v32, %v1009_v34 }
  0xb5   : > { %1467 = vmatpush3.bf16.msra.mxu1 %v775_v29  ;;  %1468 = vmatprep.mubr.msk.bf16.mxu1 %vm1618_vm0, %v1617_v3  ;;  %v1019_v47 = vsel %vm177_vm1, %v1013_v43, 0 }
  0xb6   : > { %1472 = vmatprep.subr.bf16.mxu1 %v1617_v3  ;;  %v1011_v38 = vpop.permute.xlu0 %1010 }
  0xb7   : > { %v1132_v40 = vpop.permute.xlu1 %1131  ;;  %v1014_v41 = vsel %vm1012_vm9, %v1009_v34, %v1011_v38  ;;  %v1025_v44 = vsel %vm177_vm1, %v1011_v38, 0 }
  0xb8   : > { %1397 = vmatmul.mubr.msk.bf16.vlgmr.msra.gmra.mxu0 %vm173_vm3, %v1395_v27 }
  0xb9   : > { %792 = vmatpush1.bf16.msra.mxu0 %v769_v31  ;;  %809 = vmatprep.mubr.bf16.mxu0 %v1619_v6  ;;  %v1237_v31 = vand.u32 127, %v152_v0 }
  0xba   : > { %1404 = vmatprep.subr.msk.bf16.mxu0 %vm177_vm1, %v889_v33  ;;  %v1134_v45 = vpop.permute.xlu0 %1133 }
  0xbb   : > { %v1136_v46 = vpop.permute.xlu1 %1135  ;;  %v1138_v50 = vsel %vm1137_vm10, %v1132_v40, %v1134_v45  ;;  %v1239_v36 = vadd.s32 256, %v1237_v31  ;;  %v1238_v38 = vadd.s32 128, %v1237_v31 }
  0xbc   : > { %1469 = vmatmul.mubr.msk.bf16.vlgmr.msra.gmra.mxu1 %vm173_vm3, %v1399_v35  ;;  %v1139_v48 = vsel %vm1137_vm10, %v1134_v45, %v1136_v46  ;;  %v1150_v51 = vsel %vm177_vm1, %v1136_v46, 0  ;;  %v1144_v52 = vsel %vm177_vm1, %v1138_v50, 0 }
  0xbd   : > { %1473 = vmatpush3.bf16.msra.mxu1 %v900_v37  ;;  %1474 = vmatprep.mubr.msk.bf16.mxu1 %vm1618_vm0, %v1617_v3  ;;  %v1241_v45 = vcvt.s32.f32 %v1238_v38 }
  0xbe   : > { %1478 = vmatprep.subr.bf16.mxu1 %v1617_v3 }
  0xc0   : > { %1401 = vmatmul.mubr.msk.bf16.vlgmr.msra.gmra.mxu0 %vm173_vm3, %v1399_v35 }
  0xc1   : > { %917 = vmatpush1.bf16.msra.mxu0 %v894_v39  ;;  %934 = vmatprep.mubr.bf16.mxu0 %v1619_v6 }
  0xc2   : > { %1408 = vmatprep.subr.msk.bf16.mxu0 %vm177_vm1, %v1014_v41 }
  0xc4   : > { %1475 = vmatmul.mubr.msk.bf16.vlgmr.msra.gmra.mxu1 %vm173_vm3, %v1403_v42 }
  0xc5   : > { %1479 = vmatpush3.bf16.msra.mxu1 %v1025_v44  ;;  %1480 = vmatprep.mubr.msk.bf16.mxu1 %vm1618_vm0, %v1617_v3  ;;  %v1240_v44 = vcvt.s32.f32 %v1237_v31 }
  0xc6   : > { %1484 = vmatprep.subr.bf16.mxu1 %v1617_v3 }
  0xc8   : > { %1405 = vmatmul.mubr.msk.bf16.vlgmr.msra.gmra.mxu0 %vm173_vm3, %v1403_v42  ;;  %v1242_v42 = vcvt.s32.f32 %v1239_v36 }
  0xc9   : > { %1042 = vmatpush1.bf16.msra.mxu0 %v1019_v47  ;;  %1059 = vmatprep.mubr.bf16.mxu0 %v1619_v6 }
  0xca   : > { %1412 = vmatprep.subr.msk.bf16.mxu0 %vm177_vm1, %v1139_v48 }
  0xcc   : > { %1481 = vmatmul.mubr.msk.bf16.vlgmr.msra.gmra.mxu1 %vm173_vm3, %v1407_v49 }
  0xcd   : > { %1485 = vmatpush3.bf16.msra.mxu1 %v1150_v51  ;;  %1486 = vmatprep.mubr.msk.bf16.mxu1 %vm1618_vm0, %v1617_v3  ;;  %v1244_v51 = vmul.f32 0.055555556, %v1240_v44 }
  0xd0   : > { %1409 = vmatmul.mubr.msk.bf16.vlgmr.msra.gmra.mxu0 %vm173_vm3, %v1407_v49  ;;  %v1246_v49 = vmul.f32 0.055555556, %v1242_v42 }
  0xd1   : > { %1167 = vmatpush1.bf16.msra.mxu0 %v1144_v52  ;;  %1184 = vmatprep.mubr.bf16.mxu0 %v1619_v6  ;;  %v1245_v52 = vmul.f32 0.055555556, %v1241_v45 }
  0xd4   : > { %1487 = vmatmul.mubr.msk.bf16.vlgmr.msra.gmra.mxu1 %vm173_vm3, %v1411_v53 }
  0xd8   : > { %1413 = vmatmul.mubr.msk.bf16.vlgmr.msra.gmra.mxu0 %vm173_vm3, %v1411_v53 }
 0x154   : > { %v262_v54 = vpop.f32.mrf.mxu1 }
 0x156   : > { %v1440_v55 = vpop.f32.mrf.mxu1 }
 0x158   : > { %v221_v56 = vpop.f32.mrf.mxu0  ;;  %v265_v57 = vpop.f32.mrf.mxu1 }
 0x15a   : > { %v1850_v58 = vpop.f32.mrf.mxu0  ;;  %v1441_v3 = vpop.f32.mrf.mxu1 }
 0x15c   : > { %v225_v59 = vpop.f32.mrf.mxu0  ;;  %v355_v60 = vpop.f32.mrf.mxu1 }
 0x15d   : > { %v356_v50 = vadd.f32 %v355_v60, %v262_v54 }
 0x15e   : > { %v226_v61 = vpop.f32.mrf.mxu0  ;;  %v1446_v62 = vpop.f32.mrf.mxu1 }
 0x160   : > { %v314_v6 = vpop.f32.mrf.mxu0  ;;  %v358_v63 = vpop.f32.mrf.mxu1 }
 0x161   : > { %v315_v53 = vadd.f32 %v314_v6, %v221_v56  ;;  %v1249_v63 = vfloor.f32 %v1246_v49 }
 0x162   : > { %v316_v1 = vpop.f32.mrf.mxu0  ;;  %v1447_v2 = vpop.f32.mrf.mxu1 }
 0x163   : > { %v317_v59 = vadd.f32 %v316_v1, %v1850_v58  ;;  %v1252_v6 = vmul.f32 18.0, %v1249_v63 }
 0x164   : > { %v318_v4 = vpop.f32.mrf.mxu0  ;;  %v477_v5 = vpop.f32.mrf.mxu1 }
 0x165   : > { %v485_v57 = vadd.f32 %v477_v5, %v356_v50 }
 0x166   : > { %v319_v7 = vpop.f32.mrf.mxu0  ;;  %v1452_v8 = vpop.f32.mrf.mxu1 }
 0x167   : > { %v1247_v7 = vfloor.f32 %v1244_v51  ;;  %v1248_v8 = vfloor.f32 %v1245_v52 }
 0x168   : > { %v436_v9 = vpop.f32.mrf.mxu0  ;;  %v480_v10 = vpop.f32.mrf.mxu1 }
 0x169   : > { %v483_v61 = vadd.f32 %v436_v9, %v315_v53  ;;  %v1251_v58 = vmul.f32 18.0, %v1248_v8 }
 0x16a   : > { %v438_v11 = vpop.f32.mrf.mxu0  ;;  %v1453_v12 = vpop.f32.mrf.mxu1 }
 0x16b   : > { %v484_v10 = vadd.f32 %v438_v11, %v317_v59 }
 0x16c   : > { %v440_v13 = vpop.f32.mrf.mxu0  ;;  %v602_v14 = vpop.f32.mrf.mxu1 }
 0x16d   : > { %v610_v2 = vadd.f32 %v602_v14, %v485_v57 }
 0x16e   : > { %v441_v15 = vpop.f32.mrf.mxu0  ;;  %v1458_v16 = vpop.f32.mrf.mxu1 }
 0x170   : > { %v561_v17 = vpop.f32.mrf.mxu0  ;;  %v605_v18 = vpop.f32.mrf.mxu1 }
 0x171   : > { %v608_v12 = vadd.f32 %v561_v17, %v483_v61  ;;  %v1255_v17 = vsub.f32 %v1242_v42, %v1252_v6 }
 0x172   : > { %v563_v19 = vpop.f32.mrf.mxu0  ;;  %v1459_v20 = vpop.f32.mrf.mxu1 }
 0x173   : > { %v609_v15 = vadd.f32 %v563_v19, %v484_v10  ;;  %v1250_v20 = vmul.f32 18.0, %v1247_v7  ;;  %v1254_v19 = vsub.f32 %v1241_v45, %v1251_v58  ;;  %vm1258_vm11 = vcmp.lt.f32.partialorder %v1255_v17, 16.0 }
 0x174   : > { %v565_v21 = vpop.f32.mrf.mxu0  ;;  %v727_v22 = vpop.f32.mrf.mxu1 }
 0x175   : > { %v735_v54 = vadd.f32 %v727_v22, %v610_v2  ;;  %vm1257_vm13 = vcmp.lt.f32.partialorder %v1254_v19, 16.0 }
 0x176   : > { %v566_v23 = vpop.f32.mrf.mxu0  ;;  %v1464_v24 = vpop.f32.mrf.mxu1 }
 0x178   : > { %v686_v25 = vpop.f32.mrf.mxu0  ;;  %v730_v26 = vpop.f32.mrf.mxu1 }
 0x179   : > { %v733_v16 = vadd.f32 %v686_v25, %v608_v12 }
 0x17a   : > { %v688_v27 = vpop.f32.mrf.mxu0  ;;  %v1465_v28 = vpop.f32.mrf.mxu1 }
 0x17b   : > { %v734_v1 = vadd.f32 %v688_v27, %v609_v15 }
 0x17c   : > { %v690_v29 = vpop.f32.mrf.mxu0  ;;  %v852_v30 = vpop.f32.mrf.mxu1 }
 0x17d   : > { %v860_v5 = vadd.f32 %v852_v30, %v735_v54  ;;  %v1253_v29 = vsub.f32 %v1240_v44, %v1250_v20 }
 0x17e   : > { %v691_v32 = vpop.f32.mrf.mxu0  ;;  %v1470_v33 = vpop.f32.mrf.mxu1 }
 0x17f   : > { %vm1256_vm12 = vcmp.lt.f32.partialorder %v1253_v29, 16.0 }
 0x180   : > { %v811_v34 = vpop.f32.mrf.mxu0  ;;  %v855_v35 = vpop.f32.mrf.mxu1 }
 0x181   : > { %v858_v9 = vadd.f32 %v811_v34, %v733_v16 }
 0x182   : > { %v813_v37 = vpop.f32.mrf.mxu0  ;;  %v1471_v39 = vpop.f32.mrf.mxu1 }
 0x183   : > { %v859_v24 = vadd.f32 %v813_v37, %v734_v1 }
 0x184   : > { %v815_v40 = vpop.f32.mrf.mxu0  ;;  %v977_v41 = vpop.f32.mrf.mxu1 }
 0x185   : > { %v985_v14 = vadd.f32 %v977_v41, %v860_v5 }
 0x186   : > { %v816_v43 = vpop.f32.mrf.mxu0  ;;  %v1476_v46 = vpop.f32.mrf.mxu1 }
 0x188   : > { %v936_v47 = vpop.f32.mrf.mxu0  ;;  %v980_v48 = vpop.f32.mrf.mxu1 }
 0x189   : > { %v983_v26 = vadd.f32 %v936_v47, %v858_v9 }
 0x18a   : > { %v938_v0 = vpop.f32.mrf.mxu0  ;;  %v1477_v55 = vpop.f32.mrf.mxu1 }
 0x18b   : > { %v984_v25 = vadd.f32 %v938_v0, %v859_v24 }
 0x18c   : > { %v940_v3 = vpop.f32.mrf.mxu0  ;;  %v1102_v62 = vpop.f32.mrf.mxu1 }
 0x18d   : > { %v1110_v28 = vadd.f32 %v1102_v62, %v985_v14 }
 0x18e   : > { %v941_v4 = vpop.f32.mrf.mxu0  ;;  %v1482_v13 = vpop.f32.mrf.mxu1 }
 0x190   : > { %v1061_v60 = vpop.f32.mrf.mxu0  ;;  %v1105_v56 = vpop.f32.mrf.mxu1 }
 0x191   : > { %v1108_v31 = vadd.f32 %v1061_v60, %v983_v26 }
 0x192   : > { %v1063_v18 = vpop.f32.mrf.mxu0  ;;  %v1483_v21 = vpop.f32.mrf.mxu1 }
 0x193   : > { %v1109_v35 = vadd.f32 %v1063_v18, %v984_v25 }
 0x194   : > { %v1065_v23 = vpop.f32.mrf.mxu0  ;;  %v1227_v11 = vpop.f32.mrf.mxu1 }
 0x195   : > { %v1235_v30 = vadd.f32 %v1227_v11, %v1110_v28 }
 0x196   : > { %v1066_v22 = vpop.f32.mrf.mxu0  ;;  %v1488_v32 = vpop.f32.mrf.mxu1 }
 0x197   : > { %v1267_v39 = vsel %vm1258_vm11, %v1235_v30, 0.0 }
 0x198   : > { %v1186_v33 = vpop.f32.mrf.mxu0  ;;  %v1230_v34 = vpop.f32.mrf.mxu1  ;;  %v1270_v45 = vsel %vm1269_vm14, %v1267_v39, 0.0 }
 0x199   : > { %v1233_v27 = vadd.f32 %v1186_v33, %v1108_v31 }
 0x19a   : > { %v1188_v36 = vpop.f32.mrf.mxu0  ;;  %v1489_v38 = vpop.f32.mrf.mxu1 }
 0x19b   : > { %v1234_v37 = vadd.f32 %v1188_v36, %v1109_v35  ;;  %v1265_v41 = vsel %vm1256_vm12, %v1233_v27, 0.0 }
 0x19c   : > { %v1190_v40 = vpop.f32.mrf.mxu0 }
 0x19d   : > { %v1266_v42 = vsel %vm1257_vm13, %v1234_v37, 0.0 }
 0x19e   : > { %v1191_v43 = vpop.f32.mrf.mxu0  ;;  %v1268_v44 = vadd.f32 %v1266_v42, %v1265_v41 }
 0x1a0   : > { %v1271_v46 = vadd.f32 %v1270_v45, %v1268_v44 }
 0x1a2   : > { %1272 = vadd.xlane.f32.xlu0 %v1271_v46 }
 0x22b   : > { %v1273_v47 = vpop.xlane.xlu0 %1272 }
 0x22c   : > { %v1274_v48 = vmul.f32 0.00390625, %v1273_v47 }
 0x22e   : > { %v1275_v49 = vsub.f32 %v1233_v27, %v1274_v48  ;;  %v1276_v50 = vsub.f32 %v1234_v37, %v1274_v48  ;;  %v1277_v0 = vsub.f32 %v1235_v30, %v1274_v48 }
 0x230   : > { %v1278_v51 = vsel %vm1256_vm12, %v1275_v49, 0.0  ;;  %v1279_v52 = vsel %vm1257_vm13, %v1276_v50, 0.0  ;;  %v1280_v53 = vsel %vm1258_vm11, %v1277_v0, 0.0 }
 0x231   : > { %v1281_v55 = vmul.f32 %v1278_v51, %v1278_v51  ;;  %v1282_v57 = vmul.f32 %v1279_v52, %v1279_v52  ;;  %v1283_v3 = vmul.f32 %v1280_v53, %v1280_v53 }
 0x233   : > { %v1284_v59 = vadd.f32 %v1282_v57, %v1281_v55  ;;  %v1285_v61 = vsel %vm1269_vm14, %v1283_v3, 0.0 }
 0x235   : > { %v1286_v62 = vadd.f32 %v1285_v61, %v1284_v59 }
 0x237   : > { %1287 = vadd.xlane.f32.xlu1 %v1286_v62 }
 0x2c0   : > { %v1288_v63 = vpop.xlane.xlu1 %1287 }
 0x2c1   : > { %v1289_v2 = vmul.f32 0.00390625, %v1288_v63 }
 0x2c3   : > { %v1290_v4 = vadd.f32 1e-05, %v1289_v2 }
 0x2c5   : > { %1552 = vrsqrt.f32 %v1290_v4 }
 0x2d2   : > { %v1553_v7 = vpop.eup %1552 }
 0x2d3   : > { %v1292_v8 = vmul.f32 %v1553_v7, %v1275_v49  ;;  %v1293_v10 = vmul.f32 %v1553_v7, %v1276_v50  ;;  %v1294_v12 = vmul.f32 %v1553_v7, %v1277_v0 }
 0x2d5   : > { %v1295_v13 = vmax.f32 %v1292_v8, 0.0  ;;  %v1296_v54 = vmax.f32 %v1293_v10, 0.0  ;;  %v1297_v60 = vmax.f32 %v1294_v12, 0.0 }
 0x2d7   : > { %1298 = vst [vmem:[%s136_s8] sm:$0xff] %v1295_v13  ;;  %1299 = vst [vmem:[%s136_s8 + $0x8] sm:$0xff] %v1296_v54 }
 0x2d8   : > { %1300 = vst.msk [vmem:[%s136_s8 + $0x10] sm:$0xff] %vm1269_vm14, %v1297_v60 }
 0x2d9   : > { %1567 = shalt.err (!%p1564_p3)
}
 0x2da   : > { %s1568_s26 = scalar_lea.hbm %s1867_s21, 384  ;;  %s1572_s29 = scalar_lea.hbm %s1911_s2, 768 }
 0x2db   : > { %p1569_p4 = scmp.ne.s32.totalorder %s1867_s21, %s1568_s26  ;;  %p1573_p9 = scmp.lt.s32.totalorder %s1867_s21, %s1911_s2 }
 0x2dc   : > { %p1574_p10 = scmp.lt.s32.totalorder %s1572_s29, %s1568_s26 }
 0x2dd   : > { %p1570_p7 = pnand %p1569_p4, %p1682_p5 }
 0x2de   : > { %p1575_p11 = por %p1574_p10, %p1573_p9 }
 0x2df   : > { %p1571_p8 = pneg %p1570_p7 }
 0x2e1   : > { %p1576_p12 = pnand %p1575_p11, %p1571_p8 }
 0x2e3   : > { %1579 = shalt.err (!%p1576_p12)
}
 0x2e4   : > { %1493 = dma.vmem_to_hbm [thread:$0]  (%p1682_p5), %s1869_s14, 384, %s1867_s21, %s1302_s13  }
 0x2e5 PF: > { %p1499_p13 = scmp.ge.s32.totalorder %s1614_s12, 2  ;;  %s1328_s4 = sand.u32 1, %s1602_s9  }
 0x2e6   : > { %s1329_s5 = scalar_lea.sflag [#allocation3], %s1328_s4 }
 0x2e7   : > { %p1496_p0 = pnand %p1499_p13, %p1686_p6 }
 0x2e9   : > { %p1497_p1 = pneg %p1496_p0 }
 0x2eb   : > { %1597 = dma.done.wait (%p1497_p1), %s1329_s5, 384  }
 0x2ec   : > { %1599 = vsyncadd (%p1497_p1), %s1329_s5, 4294966912  ;;  %p12_p2 = scmp.ge.s32.totalorder %s1669_s15, 4   ;;  %s1914_s9 = smov %s1606_s10 }
 0x2ed   : > { %s1915_s10 = smov %s1610_s11  ;;  %s1916_s11 = smov %s1680_s18 }
 0x2ee   : > { %s1917_s12 = smov %s1669_s15  ;;  %14 = sbr.rel (!%p12_p2) target bundleno = 3 (0x3), region = 71 }
 0x2f3   :  { %1334 = vsyncpa [#allocation3], 1 }
 0x2f4   :  { %1336 = vsyncpa [#allocation3 + $0x1], 1 }

</bundles_post_ra>
